<compile_context>
chip_gen: v6e
topology: v6e:2x2x1
jax: 0.10.0
libtpu: 0.0.40
codegen_flags: <defaults>
</compile_context>

<pallas_src>
import jax
import jax.numpy as jnp
from jax.experimental import pallas as pl
from jax.experimental.pallas import tpu as pltpu


def _qnet_kernel(state_ref, action_ref, w1s_ref, w1a_ref, b1_ref,
                 w2_ref, b2_ref, w3_ref, b3_ref, o_ref):
    # state_ref : (TB, S)    w1s_ref: (S, H)   b1_ref: (1, H) f32
    # action_ref: (TB, A)    w1a_ref: (A, H)
    #                        w2_ref : (H, H)   b2_ref: (1, H) f32
    #                        w3_ref : (8, H)   b3_ref: (1, 1) f32 [SMEM]
    # o_ref     : (1, 1, TB) f32  (lane-dense output row)
    cdt = w1s_ref.dtype  # compute dtype (bf16 by default); accumulation is f32

    # fc1: concat([state, action]) @ W1 == state @ W1_s + action @ W1_a,
    # so the concatenated activation never exists (not even in VMEM).
    h1 = (
        jnp.dot(state_ref[...], w1s_ref[...], preferred_element_type=jnp.float32)
        + jnp.dot(action_ref[...], w1a_ref[...], preferred_element_type=jnp.float32)
        + b1_ref[...]
    )
    h1 = jnp.maximum(h1, 0.0)

    # fc2
    h2 = (
        jnp.dot(h1.astype(cdt), w2_ref[...], preferred_element_type=jnp.float32)
        + b2_ref[...]
    )
    h2 = jnp.maximum(h2, 0.0)

    # fc3 (out_features == 1): W3 is zero-padded to 8 rows (row 0 is the real
    # one).  The NT dot_general (contract the minor dims of both operands,
    # i.e. W3 @ h2.T) yields a lane-dense (8, TB) result directly, so the
    # output write is full-width stores rather than a (TB, 1) masked column.
    q8 = jax.lax.dot_general(
        w3_ref[...], h2.astype(cdt),
        dimension_numbers=(((1,), (1,)), ((), ())),
        preferred_element_type=jnp.float32,
    )                                                   # (8, TB)
    q = q8[0:1, :] + b3_ref[0, 0]                       # (1, TB)
    o_ref[...] = q[None].astype(o_ref.dtype)            # (1, 1, TB)


def _round_up(n, m):
    return (n + m - 1) // m * m


def _tensorcores_per_chip():
    """Best-effort detection of dual-TensorCore chips (v7x). Defaults to 1."""
    try:
        kind = (jax.devices()[0].device_kind or "").lower()
    except Exception:
        return 1
    return 2 if ("v7" in kind or "7x" in kind) else 1


def _vmem_estimate_bytes(tile_b, s, a, h, itemsize):
    """Rough padded VMEM budget: double-buffered activation tiles + resident
    weights + f32 intermediates (generous)."""
    lane = lambda n: _round_up(n, 128)
    sub = lambda n: _round_up(n, 8)
    tb = sub(tile_b)
    acts_in = 2 * tb * (lane(s) + lane(a)) * itemsize          # state/action tiles
    out = 2 * 8 * lane(tile_b) * 4                             # (1,1,TB) out rows
    weights = 2 * ((sub(s) + sub(a) + sub(h) + 8) * lane(h) * itemsize
                   + 2 * 8 * lane(h) * 4)                      # w1s,w1a,w2,w3 + b1,b2
    interm = 3 * tb * lane(h) * 4                              # h1/h2/q f32
    return acts_in + out + weights + interm


def _vmem_limit_bytes(tile_b, s, a, h, itemsize):
    est = _vmem_estimate_bytes(tile_b, s, a, h, itemsize)
    try:
        cap = int(pltpu.get_tpu_info().vmem_capacity_bytes)    # 128 MiB v5e/v6e, 64 MiB v7x
    except Exception:
        cap = 64 * 2**20                                       # conservative fallback
    return int(min(max(1.5 * est, 16 * 2**20), 0.75 * cap))


def sa_value_forward(state, action, params, *, tile_b=1024,
                     compute_dtype=jnp.bfloat16):
    """Q(s, a): state (B, S), action (B, A) -> (B, 1) float32."""
    w1, b1, w2, b2, w3, b3 = (
        params["w1"], params["b1"], params["w2"],
        params["b2"], params["w3"], params["b3"],
    )
    B, S = state.shape
    A = action.shape[1]
    H = w1.shape[1]

    cdt = jnp.dtype(compute_dtype)
    itemsize = cdt.itemsize

    # Split W1 (concat elimination); pad W3 to 8 rows for the MXU tail.
    w1_s = w1[:S, :].astype(cdt)
    w1_a = w1[S:, :].astype(cdt)
    w2_c = w2.astype(cdt)
    w3_p = jnp.zeros((8, H), cdt).at[0, :].set(w3.reshape(H).astype(cdt))
    b1_r = b1.reshape(1, H).astype(jnp.float32)
    b2_r = b2.reshape(1, H).astype(jnp.float32)
    b3_r = b3.reshape(1, 1).astype(jnp.float32)

    # Pre-cast activations in the wrapper: removes per-tile casts in the kernel
    # and halves activation DMA bytes on the bf16 path.
    state_c = state.astype(cdt)
    action_c = action.astype(cdt)

    # --- batch-tile selection (generation aware) -----------------------------
    align = 16 if itemsize < 4 else 8
    tile_b = max(1, min(tile_b, B))
    n_cores = _tensorcores_per_chip()
    if n_cores > 1 and B >= 2 * align:
        # Dual-TC chips (v7x): ensure >=2 grid steps so "parallel" shards work.
        tile_b = min(tile_b, _round_up(pl.cdiv(B, n_cores), align))
    if tile_b < B:
        tile_b = max(align, (tile_b // align) * align)
        if tile_b >= B:
            tile_b = B
    num_tiles = pl.cdiv(B, tile_b)

    vmem_limit = _vmem_limit_bytes(tile_b, S, A, H, itemsize)

    flops = int(2 * B * ((S + A) * H + H * H + H))
    bytes_accessed = int(
        B * (S + A) * itemsize                 # activations in
        + ((S + A + H) * H + 8 * H) * itemsize # weights
        + (2 * H + 1) * 4                      # biases (f32)
        + num_tiles * tile_b * 4               # output
    )

    resident = lambda shape: pl.BlockSpec(shape, lambda i, _s=shape: (0,) * len(_s))

    out = pl.pallas_call(
        _qnet_kernel,
        out_shape=jax.ShapeDtypeStruct((num_tiles, 1, tile_b), jnp.float32),
        grid=(num_tiles,),
        in_specs=[
            pl.BlockSpec((tile_b, S), lambda i: (i, 0)),        # state tile
            pl.BlockSpec((tile_b, A), lambda i: (i, 0)),        # action tile
            resident((S, H)),                                   # w1 (state half)
            resident((A, H)),                                   # w1 (action half)
            resident((1, H)),                                   # b1
            resident((H, H)),                                   # w2
            resident((1, H)),                                   # b2
            resident((8, H)),                                   # w3 (row 0 real)
            pl.BlockSpec(memory_space=pltpu.MemorySpace.SMEM),  # b3 scalar
        ],
        out_specs=pl.BlockSpec((1, 1, tile_b), lambda i: (i, 0, 0)),
        compiler_params=pltpu.CompilerParams(
            dimension_semantics=("parallel",),   # shard batch tiles across TCs (v7x)
            vmem_limit_bytes=vmem_limit,
        ),
        cost_estimate=pl.CostEstimate(
            flops=flops, transcendentals=0, bytes_accessed=bytes_accessed),
    )(state_c, action_c, w1_s, w1_a, b1_r, w2_c, b2_r, w3_p, b3_r)

    # Lane-dense (num_tiles, 1, tile_b) -> (B, 1); padded tail rows (if B is not
    # a multiple of tile_b) are discarded here.
    return out.reshape(num_tiles * tile_b)[:B].reshape(B, 1)


def init_params(key, state_size, action_size, hidden_dim=256):
    """PyTorch-Linear-style uniform init; weights stored transposed as (in, out)."""
    ks = jax.random.split(key, 6)

    def linear(kw, kb, fan_in, fan_out):
        bound = 1.0 / jnp.sqrt(fan_in)
        w = jax.random.uniform(kw, (fan_in, fan_out), jnp.float32, -bound, bound)
        b = jax.random.uniform(kb, (1, fan_out), jnp.float32, -bound, bound)
        return w, b

    d_in = state_size + action_size
    w1, b1 = linear(ks[0], ks[1], d_in, hidden_dim)
    w2, b2 = linear(ks[2], ks[3], hidden_dim, hidden_dim)
    w3, b3 = linear(ks[4], ks[5], hidden_dim, 1)
    return {"w1": w1, "b1": b1, "w2": w2, "b2": b2, "w3": w3, "b3": b3}


def _reference(state, action, p):
    hp = jax.lax.Precision.HIGHEST
    x = jnp.concatenate([state, action], axis=-1)
    x = jax.nn.relu(jnp.dot(x, p["w1"], precision=hp) + p["b1"])
    x = jax.nn.relu(jnp.dot(x, p["w2"], precision=hp) + p["b2"])
    return jnp.dot(x, p["w3"], precision=hp) + p["b3"]


if __name__ == "__main__":
    key = jax.random.PRNGKey(0)
    k_s, k_a, k_p = jax.random.split(key, 3)

    # --- small f32 config: single grid step, tight check ----------------------
    B, S, A, H = 8, 16, 8, 32
    state = jax.random.normal(k_s, (B, S), jnp.float32)
    action = jax.random.normal(k_a, (B, A), jnp.float32)
    params = init_params(k_p, S, A, H)

    out = jax.block_until_ready(
        sa_value_forward(state, action, params, compute_dtype=jnp.float32))
    ref = _reference(state, action, params)
    assert out.shape == (B, 1), out.shape
    assert jnp.allclose(out, ref, atol=1e-4, rtol=1e-4), "f32 mismatch vs JAX reference"

    # --- tiled bf16 default: 3 grid steps, ragged last tile, loose check ------
    B2, S2, A2, H2 = 40, 16, 8, 128
    k_s2, k_a2, k_p2 = jax.random.split(jax.random.PRNGKey(0), 3)
    state2 = jax.random.normal(k_s2, (B2, S2), jnp.float32)
    action2 = jax.random.normal(k_a2, (B2, A2), jnp.float32)
    params2 = init_params(k_p2, S2, A2, H2)

    out2 = jax.block_until_ready(
        sa_value_forward(state2, action2, params2, tile_b=16))
    ref2 = _reference(state2, action2, params2)
    assert out2.shape == (B2, 1), out2.shape
    assert jnp.allclose(out2, ref2, atol=5e-2, rtol=5e-2), "bf16 mismatch vs JAX reference"

    print("KERNEL_OK")
</pallas_src>

<mosaic_0001>
module attributes {stable_mosaic.version = 11 : i64} {
  func.func @_qnet_kernel(%arg0: i32, %arg1: memref<8x16xf32, #tpu.memory_space<vmem>>, %arg2: memref<8x8xf32, #tpu.memory_space<vmem>>, %arg3: memref<16x32xf32, #tpu.memory_space<vmem>>, %arg4: memref<8x32xf32, #tpu.memory_space<vmem>>, %arg5: memref<1x32xf32, #tpu.memory_space<vmem>>, %arg6: memref<32x32xf32, #tpu.memory_space<vmem>>, %arg7: memref<1x32xf32, #tpu.memory_space<vmem>>, %arg8: memref<8x32xf32, #tpu.memory_space<vmem>>, %arg9: memref<1x1xf32, #tpu.memory_space<smem>>, %arg10: memref<1x1x8xf32, #tpu.memory_space<vmem>>) attributes {dimension_semantics = [#tpu.dimension_semantics<parallel>], iteration_bounds = array<i64: 1>, scalar_prefetch = 0 : i64, scratch_operands = 0 : i64, tpu.core_type = #tpu.core_type<tc>, window_params = [{transform_indices = @transform_0, window_bounds = array<i64: 8, 16>}, {transform_indices = @transform_1, window_bounds = array<i64: 8, 8>}, {pipeline_mode = #tpu.pipeline_mode<synchronous>, transform_indices = @transform_2, window_bounds = array<i64: 16, 32>}, {pipeline_mode = #tpu.pipeline_mode<synchronous>, transform_indices = @transform_3, window_bounds = array<i64: 8, 32>}, {pipeline_mode = #tpu.pipeline_mode<synchronous>, transform_indices = @transform_4, window_bounds = array<i64: 1, 32>}, {pipeline_mode = #tpu.pipeline_mode<synchronous>, transform_indices = @transform_5, window_bounds = array<i64: 32, 32>}, {pipeline_mode = #tpu.pipeline_mode<synchronous>, transform_indices = @transform_6, window_bounds = array<i64: 1, 32>}, {pipeline_mode = #tpu.pipeline_mode<synchronous>, transform_indices = @transform_7, window_bounds = array<i64: 8, 32>}, {transform_indices = @transform_8, window_bounds = array<i64: 1, 1>}, {transform_indices = @transform_9, window_bounds = array<i64: 1, 1, 8>}]} {
    %c0 = arith.constant 0 : index
    %c0_0 = arith.constant 0 : index
    %0 = vector.load %arg1[%c0, %c0_0] : memref<8x16xf32, #tpu.memory_space<vmem>>, vector<8x16xf32>
    %c0_1 = arith.constant 0 : index
    %c0_2 = arith.constant 0 : index
    %1 = vector.load %arg3[%c0_1, %c0_2] : memref<16x32xf32, #tpu.memory_space<vmem>>, vector<16x32xf32>
    %cst = arith.constant dense<0.000000e+00> : vector<8x32xf32>
    %2 = tpu.matmul %0, %1, %cst {dimension_numbers = #tpu.dot_dimension_numbers<[1], [0], [0], [1], [0, 0, 1, 1], [], []>} : vector<8x16xf32>, vector<16x32xf32>, vector<8x32xf32> -> vector<8x32xf32>
    %c0_3 = arith.constant 0 : index
    %c0_4 = arith.constant 0 : index
    %3 = vector.load %arg2[%c0_3, %c0_4] : memref<8x8xf32, #tpu.memory_space<vmem>>, vector<8x8xf32>
    %c0_5 = arith.constant 0 : index
    %c0_6 = arith.constant 0 : index
    %4 = vector.load %arg4[%c0_5, %c0_6] : memref<8x32xf32, #tpu.memory_space<vmem>>, vector<8x32xf32>
    %cst_7 = arith.constant dense<0.000000e+00> : vector<8x32xf32>
    %5 = tpu.matmul %3, %4, %cst_7 {dimension_numbers = #tpu.dot_dimension_numbers<[1], [0], [0], [1], [0, 0, 1, 1], [], []>} : vector<8x8xf32>, vector<8x32xf32>, vector<8x32xf32> -> vector<8x32xf32>
    %6 = arith.addf %2, %5 : vector<8x32xf32>
    %c0_8 = arith.constant 0 : index
    %c0_9 = arith.constant 0 : index
    %7 = vector.load %arg5[%c0_8, %c0_9] : memref<1x32xf32, #tpu.memory_space<vmem>>, vector<1x32xf32>
    %8 = vector.broadcast %7 : vector<1x32xf32> to vector<8x32xf32>
    %9 = arith.addf %6, %8 : vector<8x32xf32>
    %cst_10 = arith.constant 0.000000e+00 : f32
    %10 = vector.broadcast %cst_10 : f32 to vector<8x32xf32>
    %11 = arith.maximumf %9, %10 : vector<8x32xf32>
    %c0_11 = arith.constant 0 : index
    %c0_12 = arith.constant 0 : index
    %12 = vector.load %arg6[%c0_11, %c0_12] : memref<32x32xf32, #tpu.memory_space<vmem>>, vector<32x32xf32>
    %cst_13 = arith.constant dense<0.000000e+00> : vector<8x32xf32>
    %13 = tpu.matmul %11, %12, %cst_13 {dimension_numbers = #tpu.dot_dimension_numbers<[1], [0], [0], [1], [0, 0, 1, 1], [], []>} : vector<8x32xf32>, vector<32x32xf32>, vector<8x32xf32> -> vector<8x32xf32>
    %c0_14 = arith.constant 0 : index
    %c0_15 = arith.constant 0 : index
    %14 = vector.load %arg7[%c0_14, %c0_15] : memref<1x32xf32, #tpu.memory_space<vmem>>, vector<1x32xf32>
    %15 = vector.broadcast %14 : vector<1x32xf32> to vector<8x32xf32>
    %16 = arith.addf %13, %15 : vector<8x32xf32>
    %cst_16 = arith.constant 0.000000e+00 : f32
    %17 = vector.broadcast %cst_16 : f32 to vector<8x32xf32>
    %18 = arith.maximumf %16, %17 : vector<8x32xf32>
    %c0_17 = arith.constant 0 : index
    %c0_18 = arith.constant 0 : index
    %19 = vector.load %arg8[%c0_17, %c0_18] : memref<8x32xf32, #tpu.memory_space<vmem>>, vector<8x32xf32>
    %cst_19 = arith.constant dense<0.000000e+00> : vector<8x8xf32>
    %20 = tpu.matmul %19, %18, %cst_19 {dimension_numbers = #tpu.dot_dimension_numbers<[1], [1], [0], [0], [0, 0, 1, 0], [], []>} : vector<8x32xf32>, vector<8x32xf32>, vector<8x8xf32> -> vector<8x8xf32>
    %21 = vector.extract_strided_slice %20 {offsets = [0, 0], sizes = [1, 8], strides = [1, 1]} : vector<8x8xf32> to vector<1x8xf32>
    %c0_20 = arith.constant 0 : index
    %c0_21 = arith.constant 0 : index
    %22 = memref.load %arg9[%c0_20, %c0_21] : memref<1x1xf32, #tpu.memory_space<smem>>
    %23 = vector.broadcast %22 : f32 to vector<1x8xf32>
    %24 = arith.addf %21, %23 : vector<1x8xf32>
    %25 = vector.shape_cast %24 : vector<1x8xf32> to vector<1x1x8xf32>
    %c0_22 = arith.constant 0 : index
    %c0_23 = arith.constant 0 : index
    %c0_24 = arith.constant 0 : index
    %26 = vector.load %arg10[%c0_22, %c0_23, %c0_24] : memref<1x1x8xf32, #tpu.memory_space<vmem>>, vector<1x1x8xf32>
    tpu.vector_store %arg10[%c0_22, %c0_23, %c0_24], %25 {strides = array<i32>} : memref<1x1x8xf32, #tpu.memory_space<vmem>>, vector<1x1x8xf32>,
    return
  }
  func.func @transform_0(%arg0: i32) -> (i32, i32) {
    %c0_i32 = arith.constant 0 : i32
    %c0_i32_0 = arith.constant 0 : i32
    return %arg0, %c0_i32 : i32, i32
  }
  func.func @transform_1(%arg0: i32) -> (i32, i32) {
    %c0_i32 = arith.constant 0 : i32
    %c0_i32_0 = arith.constant 0 : i32
    return %arg0, %c0_i32 : i32, i32
  }
  func.func @transform_2(%arg0: i32) -> (i32, i32) {
    %c0_i32 = arith.constant 0 : i32
    %c0_i32_0 = arith.constant 0 : i32
    %c0_i32_1 = arith.constant 0 : i32
    return %c0_i32, %c0_i32_0 : i32, i32
  }
  func.func @transform_3(%arg0: i32) -> (i32, i32) {
    %c0_i32 = arith.constant 0 : i32
    %c0_i32_0 = arith.constant 0 : i32
    %c0_i32_1 = arith.constant 0 : i32
    return %c0_i32, %c0_i32_0 : i32, i32
  }
  func.func @transform_4(%arg0: i32) -> (i32, i32) {
    %c0_i32 = arith.constant 0 : i32
    %c0_i32_0 = arith.constant 0 : i32
    %c0_i32_1 = arith.constant 0 : i32
    return %c0_i32, %c0_i32_0 : i32, i32
  }
  func.func @transform_5(%arg0: i32) -> (i32, i32) {
    %c0_i32 = arith.constant 0 : i32
    %c0_i32_0 = arith.constant 0 : i32
    %c0_i32_1 = arith.constant 0 : i32
    return %c0_i32, %c0_i32_0 : i32, i32
  }
  func.func @transform_6(%arg0: i32) -> (i32, i32) {
    %c0_i32 = arith.constant 0 : i32
    %c0_i32_0 = arith.constant 0 : i32
    %c0_i32_1 = arith.constant 0 : i32
    return %c0_i32, %c0_i32_0 : i32, i32
  }
  func.func @transform_7(%arg0: i32) -> (i32, i32) {
    %c0_i32 = arith.constant 0 : i32
    %c0_i32_0 = arith.constant 0 : i32
    %c0_i32_1 = arith.constant 0 : i32
    return %c0_i32, %c0_i32_0 : i32, i32
  }
  func.func @transform_8(%arg0: i32) -> (i32, i32) {
    %c0_i32 = arith.constant 0 : i32
    %c0_i32_0 = arith.constant 0 : i32
    %c0_i32_1 = arith.constant 0 : i32
    return %c0_i32, %c0_i32_0 : i32, i32
  }
  func.func @transform_9(%arg0: i32) -> (i32, i32, i32) {
    %c0_i32 = arith.constant 0 : i32
    %c0_i32_0 = arith.constant 0 : i32
    %c0_i32_1 = arith.constant 0 : i32
    return %arg0, %c0_i32, %c0_i32_0 : i32, i32, i32
  }
}

</mosaic_0001>

<bundles_post_ra>
// kernel: tpu_custom_call.1
= control target key start
LH: loop header
LB: loop body
LE: loop exit
PB: predicated region body
PF: predicated region fallthrough
CT: control target
= control target key end

     0   :  { %15 = vsyncpa [#allocation4], 0  ;;  %s722_s0 = inlined_call_operand.hbm [shape: f32[8,16], index: 0, kind: input, shape index: {}]   ;;  %s723_s1 = inlined_call_operand.hbm [shape: f32[8,8], index: 1, kind: input, shape index: {}]   ;;  %s724_s2 = inlined_call_operand.hbm [shape: f32[16,32], index: 2, kind: input, shape index: {}]   ;;  %s725_s3 = inlined_call_operand.hbm [shape: f32[8,32], index: 3, kind: input, shape index: {}]   ;;  %s726_s4 = inlined_call_operand.vmem [shape: f32[1,32], index: 4, kind: input, shape index: {}]   ;;  %s727_s5 = inlined_call_operand.hbm [shape: f32[32,32], index: 5, kind: input, shape index: {}]   ;;  %s728_s6 = inlined_call_operand.vmem [shape: f32[1,32], index: 6, kind: input, shape index: {}]   ;;  %s729_s7 = inlined_call_operand.vmem [shape: f32[8,32], index: 7, kind: input, shape index: {}]   ;;  %s730_s8 = inlined_call_operand.<no memory space> [shape: f32[1,1], index: 8, kind: input, shape index: {}]   ;;  %s731_s9 = inlined_call_operand.hbm [shape: f32[1,1,8], index: 9, kind: output, shape index: {}]  }
   0x1   :  { %16 = vsyncpa [#allocation7], 0 }
   0x2   :  { %17 = vsyncpa [#allocation10], 0 }
   0x3   :  { %18 = vsyncpa [#allocation5], 0  ;;  %s628_s30 = smov [#allocation6]   ;;  %s629_s11 = smov [#allocation9]  }
   0x4   :  { %s35_s10 = sshll.u32 %s628_s30, 4  ;;  %s57_s12 = sshll.u32 %s629_s11, 4  ;;  %s36_s10 = int_to_ptr.vmem [resolvable:$true] %s35_s10  ;;  %s58_s12 = int_to_ptr.vmem [resolvable:$true] %s57_s12 }
   0x5   :  { %s508_s13 = scalar_lea.vmem %s36_s10, 128  ;;  %p513_p1 = scmp.lt.s32.totalorder %s36_s10, %s36_s10 }
   0x6   :  { %p509_p0 = scmp.ne.s32.totalorder %s36_s10, %s508_s13  ;;  %p514_p2 = scmp.lt.s32.totalorder %s508_s13, %s508_s13 }
   0x8   :  { %p515_p3 = por %p514_p2, %p513_p1 }
   0xa   :  { %p516_p4 = pnand %p515_p3, %p509_p0 }
   0xc   :  { %519 = shalt.err (!%p516_p4)
}
   0xd   :  { %38 = dma.hbm_to_vmem [thread:$0]  %s723_s1, 128, %s36_s10, [#allocation7]  }
   0xe   :  { %s528_s16 = scalar_lea.vmem %s58_s12, 128  ;;  %p533_p6 = scmp.lt.s32.totalorder %s58_s12, %s58_s12 }
   0xf   :  { %p529_p5 = scmp.ne.s32.totalorder %s58_s12, %s528_s16  ;;  %p534_p7 = scmp.lt.s32.totalorder %s528_s16, %s528_s16 }
  0x11   :  { %p535_p8 = por %p534_p7, %p533_p6 }
  0x13   :  { %p536_p9 = pnand %p535_p8, %p529_p5 }
  0x15   :  { %539 = shalt.err (!%p536_p9)
}
  0x16   :  { %60 = dma.hbm_to_vmem [thread:$0]  %s725_s3, 128, %s58_s12, [#allocation10]  }
  0x17   :  { %s630_s19 = smov [#allocation3]   ;;  %s631_s21 = smov [#allocation8]  }
  0x18   :  { %s25_s20 = sshll.u32 %s630_s19, 4  ;;  %s44_s22 = sshll.u32 %s631_s21, 4  ;;  %s26_s20 = int_to_ptr.vmem [resolvable:$true] %s25_s20  ;;  %s45_s22 = int_to_ptr.vmem [resolvable:$true] %s44_s22 }
  0x19   :  { %s548_s23 = scalar_lea.vmem %s26_s20, 128  ;;  %p553_p11 = scmp.lt.s32.totalorder %s26_s20, %s26_s20 }
  0x1a   :  { %p549_p10 = scmp.ne.s32.totalorder %s26_s20, %s548_s23  ;;  %p554_p12 = scmp.lt.s32.totalorder %s548_s23, %s548_s23 }
  0x1c   :  { %p555_p13 = por %p554_p12, %p553_p11 }
  0x1e   :  { %p556_p0 = pnand %p555_p13, %p549_p10 }
  0x20   :  { %559 = shalt.err (!%p556_p0)
}
  0x21   :  { %28 = dma.hbm_to_vmem [thread:$0]  %s722_s0, 128, %s26_s20, [#allocation4]  }
  0x22   :  { %s568_s25 = scalar_lea.vmem %s45_s22, 256  ;;  %p573_p2 = scmp.lt.s32.totalorder %s45_s22, %s45_s22 }
  0x23   :  { %p569_p1 = scmp.ne.s32.totalorder %s45_s22, %s568_s25  ;;  %p574_p3 = scmp.lt.s32.totalorder %s568_s25, %s568_s25 }
  0x25   :  { %p575_p4 = por %p574_p3, %p573_p2 }
  0x27   :  { %p576_p5 = pnand %p575_p4, %p569_p1 }
  0x29   :  { %579 = shalt.err (!%p576_p5)
}
  0x2a   :  { %s632_s3 = smov 128   ;;  %s633_s26 = smov 8  }
  0x2b   :  { %50 = dma.hbm_to_vmem [thread:$0]  %s724_s2, 256, %s45_s22, [#allocation7], %s632_s3, %s632_s3, %s633_s26  }
  0x2c   :  { %s634_s29 = smov [#allocation11]  }
  0x2d   :  { %s68_s30 = sshll.u32 %s634_s29, 4  ;;  %s69_s30 = int_to_ptr.vmem [resolvable:$true] %s68_s30 }
  0x2e   :  { %s588_s10 = scalar_lea.vmem %s69_s30, 512  ;;  %p593_p7 = scmp.lt.s32.totalorder %s69_s30, %s69_s30 }
  0x2f   :  { %p589_p6 = scmp.ne.s32.totalorder %s69_s30, %s588_s10  ;;  %p594_p8 = scmp.lt.s32.totalorder %s588_s10, %s588_s10 }
  0x31   :  { %p595_p9 = por %p594_p8, %p593_p7 }
  0x33   :  { %p596_p10 = pnand %p595_p9, %p589_p6 }
  0x35   :  { %599 = shalt.err (!%p596_p10)
}
  0x36   :  { %74 = dma.hbm_to_vmem [thread:$0]  %s727_s5, 512, %s69_s30, [#allocation10], %s632_s3, %s632_s3, %s633_s26  }
  0x37   :  { %620 = dma.done.wait [#allocation4], 128  }
  0x38   :  { %621 = vsyncadd [#allocation4], 4294967168 }
  0x39   :  { %622 = dma.done.wait [#allocation7], 384  }
  0x3a   :  { %623 = vsyncadd [#allocation7], 4294966912 }
  0x3b   :  { %624 = dma.done.wait [#allocation10], 640  }
  0x3c   :  { %625 = vsyncadd [#allocation10], 4294966656  ;;  %v635_v0 = vmov 0.0   ;;  %vm636_vm0 = vmmov 0   ;;  %vm101_vm1 = vcmask 64512   ;;  %v100_v1 = vld [vmem:[#allocation9] sm:$0xff]  ;;  %v422_v24 = vstv %s730_s8 }
  0x3d   :  { %462 = vmatprep.subr.mxu0 %v635_v0  ;;  %467 = vmatprep.subr.mxu1 %v635_v0  ;;  %v98_v2 = vld [vmem:[#allocation8 + $0x8] sm:$0xff]  ;;  %v99_v3 = vld [vmem:[#allocation6] sm:$0xff]  ;;  %v97_v4 = vld [vmem:[#allocation8] sm:$0xff]  ;;  %vm175_vm2 = vcmask 130048   ;;  %vm269_vm3 = vcmask 261120   ;;  %s637_s17 = smov [#allocation12]  }
  0x3e   :  { %464 = vmatprep.mubr.msk.f32.mxu0 %vm636_vm0, %v635_v0  ;;  %471 = vmatprep.mubr.msk.f32.mxu1 %vm636_vm0, %v635_v0  ;;  %v96_v5 = vld [vmem:[#allocation3] sm:$0xff]  ;;  %v260_v7 = vld [vmem:[#allocation11 + $0x10] sm:$0xff]  ;;  %v259_v8 = vld [vmem:[#allocation11 + $0x8] sm:$0xff]  ;;  %s432_s18 = sshll.u32 %s637_s17, 4  ;;  %vm424_vm4 = vcmask 57344   ;;  %s433_s18 = int_to_ptr.vmem [resolvable:$true] %s432_s18 }
  0x3f   :  { %463 = vmatpush3.msra.mxu0 %v100_v1  ;;  %468 = vmatpush3.msra.mxu1 %v98_v2  ;;  %v261_v6 = vld [vmem:[#allocation11 + $0x18] sm:$0xff]  ;;  %v258_v9 = vld [vmem:[#allocation11] sm:$0xff]  ;;  %s604_s19 = scalar_lea.vmem %s433_s18, 32  ;;  %p605_p12 = scmp.lt.s32.totalorder %s433_s18, %s433_s18 }
  0x40   :  { %465 = vmatmul.mubr.msk.f32.vlgmr.msra.gmra.mxu0 %vm101_vm1, %v99_v3  ;;  %469 = vmatprep.subr.mxu1 %v635_v0  ;;  %v445_v13 = vld [vmem:[%s726_s4] ss:$0 sm:$0xff] }
  0x41   :  { %470 = vmatpush3.msra.mxu1 %v97_v4  ;;  %474 = vmatprep.subr.mxu0 %v635_v0  ;;  %v446_v18 = vld [vmem:[%s728_s6] ss:$0 sm:$0xff]  ;;  %s600_s6 = scalar_lea.vmem %s433_s18, 16 }
  0x42   :  { %472 = vmatmul.mubr.msk.f32.vlgmr.msra.gmra.mxu1 %vm175_vm2, %v96_v5  ;;  %482 = vmatprep.mubr.msk.f32.mxu0 %vm636_vm0, %v635_v0  ;;  %v344_v23 = vld [vmem:[%s729_s7] sm:$0xff]  ;;  %p601_p11 = scmp.ne.s32.totalorder %s433_s18, %s600_s6  ;;  %p606_p13 = scmp.lt.s32.totalorder %s604_s19, %s600_s6 }
  0x43   :  { %485 = vmatprep.subr.mxu1 %v635_v0  ;;  %487 = vmatprep.mubr.msk.f32.mxu1 %vm636_vm0, %v635_v0 }
  0x44   :  { %475 = vmatpush3.msra.mxu0 %v261_v6  ;;  %p607_p0 = por %p606_p13, %p605_p12 }
  0x45   :  { %476 = vmatprep.subr.mxu0 %v635_v0 }
  0x46   :  { %477 = vmatpush3.msra.mxu0 %v260_v7  ;;  %p608_p1 = pnand %p607_p0, %p601_p11 }
  0x47   :  { %478 = vmatprep.subr.mxu0 %v635_v0 }
  0x48   :  { %479 = vmatpush3.msra.mxu0 %v259_v8 }
  0x49   :  { %480 = vmatprep.subr.mxu0 %v635_v0 }
  0x4a   :  { %481 = vmatpush3.msra.mxu0 %v258_v9 }
 0x100   :  { %v171_v10 = vpop.f32.mrf.mxu0 }
 0x102   :  { %v466_v11 = vpop.f32.mrf.mxu0  ;;  %v245_v12 = vpop.f32.mrf.mxu1 }
 0x103   :  { %v246_v14 = vadd.f32 %v245_v12, %v171_v10 }
 0x104   :  { %v473_v15 = vpop.f32.mrf.mxu1 }
 0x105   :  { %v256_v16 = vadd.f32 %v445_v13, %v246_v14 }
 0x107   :  { %v257_v17 = vmax.f32 %v256_v16, 0.0 }
 0x109   :  { %483 = vmatmul.mubr.msk.f32.vlgmr.msra.gmra.mxu0 %vm269_vm3, %v257_v17 }
 0x1c9   :  { %v339_v19 = vpop.f32.mrf.mxu0 }
 0x1ca   :  { %v340_v20 = vadd.f32 %v446_v18, %v339_v19 }
 0x1cb   :  { %v484_v21 = vpop.f32.mrf.mxu0 }
 0x1cc   :  { %v343_v22 = vmax.f32 %v340_v20, 0.0 }
 0x1ce   :  { %486 = vmatpush3.xpose.msk.msra.mxu1 %vm269_vm3, %v343_v22 }
 0x1d1   :  { %488 = vmatmul.mubr.msk.f32.vlgmr.msra.gmra.mxu1 %vm269_vm3, %v344_v23 }
 0x291   :  { %v417_v25 = vpop.f32.mrf.mxu1 }
 0x292   :  { %v423_v26 = vadd.f32 %v422_v24, %v417_v25 }
 0x293   :  { %v489_v27 = vpop.f32.mrf.mxu1 }
 0x294   :  { %425 = vst.msk [vmem:[#allocation12] sm:$0x1] %vm424_vm4, %v423_v26 }
 0x295   :  { %611 = shalt.err (!%p608_p1)
}
 0x296   :  { %435 = dma.vmem_to_hbm [thread:$0]  %s433_s18, 16, %s731_s9, [#allocation5]  }
 0x297   :  { %626 = dma.done.wait [#allocation5], 16  }
 0x298   :  { %627 = vsyncadd [#allocation5], 4294967280 }
 0x299   :  { %439 = vsyncpa [#allocation4], 1 }
 0x29a   :  { %440 = vsyncpa [#allocation7], 1 }
 0x29b   :  { %441 = vsyncpa [#allocation10], 1 }
 0x29c   :  { %442 = vsyncpa [#allocation5], 1 }

</bundles_post_ra>
